<compile_context>
chip_gen: v6e
topology: v6e:2x2x1
jax: 0.10.0
libtpu: 0.0.40
codegen_flags: <defaults>
</compile_context>

<pallas_src>
import math

import jax
import jax.numpy as jnp
from jax.experimental import pallas as pl
from jax.experimental.pallas import tpu as pltpu

MIN_VALUE = 0.9832
MAX_VALUE = -8.6984

_LANE = 512      # lane-dense last dim (multiple of 128)
_TM_MAX = 1024   # max rows per tile -> (1024, 512) f32 == 2 MiB per buffer


def _relu_clamp_kernel(x_ref, o_ref):
    v = x_ref[...]
    v = jnp.maximum(v, 0.0)        # ReLU (avg_pool2d k=1 is identity)
    v = jnp.maximum(v, MIN_VALUE)  # clamp_min
    v = jnp.minimum(v, MAX_VALUE)  # clamp_max
    o_ref[...] = v


def model_forward(x):
    orig_shape = x.shape
    dtype = x.dtype
    total = math.prod(orig_shape)

    # Flatten to a lane-dense 2-D slab, padded to whole (tm, _LANE) tiles.
    rows = pl.cdiv(total, _LANE)
    rows = pl.cdiv(rows, 8) * 8              # sublane (8) multiple
    tm = min(_TM_MAX, rows)                  # rows is a multiple of 8, so tm is too
    rows = pl.cdiv(rows, tm) * tm            # whole number of tiles
    padded_total = rows * _LANE

    x_flat = x.reshape(-1)
    if padded_total != total:
        x_flat = jnp.pad(x_flat, (0, padded_total - total))
    x2d = x_flat.reshape(rows, _LANE)

    out2d = pl.pallas_call(
        _relu_clamp_kernel,
        out_shape=jax.ShapeDtypeStruct((rows, _LANE), dtype),
        grid=(rows // tm,),
        in_specs=[pl.BlockSpec((tm, _LANE), lambda i: (i, 0))],
        out_specs=pl.BlockSpec((tm, _LANE), lambda i: (i, 0)),
        compiler_params=pltpu.CompilerParams(
            dimension_semantics=("parallel",)),
    )(x2d)

    out_flat = out2d.reshape(-1)
    if padded_total != total:
        out_flat = out_flat[:total]
    return out_flat.reshape(orig_shape)


def _reference(x):
    return jnp.minimum(
        jnp.maximum(jnp.maximum(x, 0.0), MIN_VALUE), MAX_VALUE
    )


if __name__ == "__main__":
    key = jax.random.PRNGKey(0)
    k1, k2 = jax.random.split(key)

    # Representative small shape for the module (NCHW).
    x_main = jax.random.normal(k1, (2, 4, 16, 16), dtype=jnp.float32)
    out_main = model_forward(x_main)
    jax.block_until_ready(out_main)
    assert out_main.shape == x_main.shape
    assert jnp.allclose(out_main, _reference(x_main)), "mismatch vs reference"

    # Original tiny test shape (exercises the padding path).
    x_tiny = jax.random.normal(k2, (1, 2, 2, 2), dtype=jnp.float32)
    out_tiny = model_forward(x_tiny)
    jax.block_until_ready(out_tiny)
    assert out_tiny.shape == x_tiny.shape
    assert jnp.allclose(out_tiny, _reference(x_tiny)), "mismatch vs reference"

    print("KERNEL_OK")
</pallas_src>

<mosaic_0001>
module attributes {stable_mosaic.version = 11 : i64} {
  func.func @_relu_clamp_kernel(%arg0: i32, %arg1: memref<8x512xf32, #tpu.memory_space<vmem>>, %arg2: memref<8x512xf32, #tpu.memory_space<vmem>>) attributes {dimension_semantics = [#tpu.dimension_semantics<parallel>], iteration_bounds = array<i64: 1>, scalar_prefetch = 0 : i64, scratch_operands = 0 : i64, tpu.core_type = #tpu.core_type<tc>, window_params = [{transform_indices = @transform_0, window_bounds = array<i64: 8, 512>}, {transform_indices = @transform_1, window_bounds = array<i64: 8, 512>}]} {
    %c0 = arith.constant 0 : index
    %c0_0 = arith.constant 0 : index
    %0 = vector.load %arg1[%c0, %c0_0] : memref<8x512xf32, #tpu.memory_space<vmem>>, vector<8x512xf32>
    %cst = arith.constant 0.000000e+00 : f32
    %1 = vector.broadcast %cst : f32 to vector<8x512xf32>
    %2 = arith.maximumf %0, %1 : vector<8x512xf32>
    %cst_1 = arith.constant 9.832000e-01 : f32
    %3 = vector.broadcast %cst_1 : f32 to vector<8x512xf32>
    %4 = arith.maximumf %2, %3 : vector<8x512xf32>
    %cst_2 = arith.constant -8.69839954 : f32
    %5 = vector.broadcast %cst_2 : f32 to vector<8x512xf32>
    %6 = arith.minimumf %4, %5 : vector<8x512xf32>
    %c0_3 = arith.constant 0 : index
    %c0_4 = arith.constant 0 : index
    %7 = vector.load %arg2[%c0_3, %c0_4] : memref<8x512xf32, #tpu.memory_space<vmem>>, vector<8x512xf32>
    tpu.vector_store %arg2[%c0_3, %c0_4], %6 {strides = array<i32>} : memref<8x512xf32, #tpu.memory_space<vmem>>, vector<8x512xf32>,
    return
  }
  func.func @transform_0(%arg0: i32) -> (i32, i32) {
    %c0_i32 = arith.constant 0 : i32
    %c0_i32_0 = arith.constant 0 : i32
    return %arg0, %c0_i32 : i32, i32
  }
  func.func @transform_1(%arg0: i32) -> (i32, i32) {
    %c0_i32 = arith.constant 0 : i32
    %c0_i32_0 = arith.constant 0 : i32
    return %arg0, %c0_i32 : i32, i32
  }
}

</mosaic_0001>

<bundles_post_ra>
// kernel: tpu_custom_call.1
= control target key start
LH: loop header
LB: loop body
LE: loop exit
PB: predicated region body
PF: predicated region fallthrough
CT: control target
= control target key end

     0   :  { %6 = vsyncpa [#allocation3], 0  ;;  %s120_s0 = inlined_call_operand.hbm [shape: f32[8,512], index: 0, kind: input, shape index: {}]   ;;  %s121_s1 = inlined_call_operand.hbm [shape: f32[8,512], index: 1, kind: output, shape index: {}]  }
   0x1   :  { %7 = vsyncpa [#allocation4], 0  ;;  %s102_s6 = smov [#allocation2]  }
   0x2   :  { %s14_s7 = sshll.u32 %s102_s6, 4  ;;  %s15_s7 = int_to_ptr.vmem [resolvable:$true] %s14_s7 }
   0x3   :  { %s66_s8 = scalar_lea.vmem %s15_s7, 512  ;;  %p71_p1 = scmp.lt.s32.totalorder %s15_s7, %s15_s7 }
   0x4   :  { %p67_p0 = scmp.ne.s32.totalorder %s15_s7, %s66_s8  ;;  %p72_p2 = scmp.lt.s32.totalorder %s66_s8, %s66_s8 }
   0x6   :  { %p73_p3 = por %p72_p2, %p71_p1 }
   0x8   :  { %p74_p4 = pnand %p73_p3, %p67_p0 }
   0xa   :  { %77 = shalt.err (!%p74_p4)
}
   0xb   :  { %17 = dma.hbm_to_vmem [thread:$0]  %s120_s0, 512, %s15_s7, [#allocation3]  }
   0xc   :  { %98 = dma.done.wait [#allocation3], 512  }
   0xd   :  { %99 = vsyncadd [#allocation3], 4294966784  ;;  %v21_v0 = vld [vmem:[#allocation2] sm:$0xff]  ;;  %v22_v1 = vld [vmem:[#allocation2 + $0x8] sm:$0xff]  ;;  %s103_s11 = smov [#allocation5]  }
   0xe   :  { %v23_v2 = vld [vmem:[#allocation2 + $0x10] sm:$0xff]  ;;  %v25_v3 = vmax.f32 %v21_v0, 0.0  ;;  %v26_v4 = vmax.f32 %v22_v1, 0.0  ;;  %v24_v6 = vld [vmem:[#allocation2 + $0x18] sm:$0xff]  ;;  %s47_s12 = sshll.u32 %s103_s11, 4  ;;  %s48_s12 = int_to_ptr.vmem [resolvable:$true] %s47_s12 }
   0xf   :  { %v27_v5 = vmax.f32 %v23_v2, 0.0  ;;  %v28_v7 = vmax.f32 %v24_v6, 0.0  ;;  %s78_s0 = scalar_lea.vmem %s48_s12, 512  ;;  %p83_p6 = scmp.lt.s32.totalorder %s48_s12, %s48_s12 }
  0x10   :  { %v29_v8 = vmax.f32 %v25_v3, 0.9832  ;;  %v30_v9 = vmax.f32 %v26_v4, 0.9832  ;;  %p79_p5 = scmp.ne.s32.totalorder %s48_s12, %s78_s0  ;;  %p84_p7 = scmp.lt.s32.totalorder %s78_s0, %s78_s0 }
  0x11   :  { %v31_v10 = vmax.f32 %v27_v5, 0.9832  ;;  %v32_v11 = vmax.f32 %v28_v7, 0.9832 }
  0x12   :  { %v33_v12 = vmin.f32 %v29_v8, -8.6984  ;;  %v34_v13 = vmin.f32 %v30_v9, -8.6984  ;;  %p85_p8 = por %p84_p7, %p83_p6 }
  0x13   :  { %v35_v14 = vmin.f32 %v31_v10, -8.6984  ;;  %v36_v15 = vmin.f32 %v32_v11, -8.6984 }
  0x14   :  { %37 = vst [vmem:[#allocation5] sm:$0xff] %v33_v12  ;;  %38 = vst [vmem:[#allocation5 + $0x8] sm:$0xff] %v34_v13  ;;  %p86_p9 = pnand %p85_p8, %p79_p5 }
  0x15   :  { %39 = vst [vmem:[#allocation5 + $0x10] sm:$0xff] %v35_v14  ;;  %40 = vst [vmem:[#allocation5 + $0x18] sm:$0xff] %v36_v15 }
  0x16   :  { %89 = shalt.err (!%p86_p9)
}
  0x17   :  { %50 = dma.vmem_to_hbm [thread:$0]  %s48_s12, 512, %s121_s1, [#allocation4]  }
  0x18   :  { %100 = dma.done.wait [#allocation4], 512  }
  0x19   :  { %101 = vsyncadd [#allocation4], 4294966784 }
  0x1a   :  { %54 = vsyncpa [#allocation3], 1 }
  0x1b   :  { %55 = vsyncpa [#allocation4], 1 }

</bundles_post_ra>
